<compile_context>
chip_gen: v7x
topology: tpu7x:2x2x1
jax: 0.10.0
libtpu: 0.0.40
codegen_flags: <defaults>
</compile_context>

<pallas_src>
import functools
import math

import jax
import jax.numpy as jnp
import numpy as np
from jax import lax
from jax.experimental import pallas as pl
from jax.experimental.pallas import tpu as pltpu

# Large finite negative used both as the causal fill value and the running-max
# init: exp(x - m) underflows to exactly 0 for masked entries (same result as
# -inf) but never produces (-inf) - (-inf) NaNs.
_MASK_VALUE = -0.7 * float(np.finfo(np.float32).max)


def _pick_tile(n, max_tile=128):
    """Largest tile <= max_tile that divides n with a sublane-friendly size
    (multiple of 8), else the full extent (always a legal block dim)."""
    if n <= max_tile:
        return n
    if n % max_tile == 0:
        return max_tile
    for t in range(max_tile - 8, 0, -8):
        if n % t == 0:
            return t
    return n


def _flash_attn_kernel(q_ref, k_ref, v_ref, o_ref, m_sc, l_sc, acc_sc, *,
                       scale, causal, tq, tk):
    # Block shapes:
    #   q_ref: (1, H, tq, E)   k_ref: (1, H, tk, E)   v_ref: (1, H, tk, Ev)
    #   o_ref: (1, H, tq, Ev)
    # VMEM scratch (persists across the kv grid axis):
    #   m_sc, l_sc: (H, tq, 1) f32   acc_sc: (H, tq, Ev) f32
    qi = pl.program_id(1)
    ki = pl.program_id(2)
    nk = pl.num_programs(2)

    @pl.when(ki == 0)
    def _init():
        m_sc[...] = jnp.full_like(m_sc, _MASK_VALUE)
        l_sc[...] = jnp.zeros_like(l_sc)
        acc_sc[...] = jnp.zeros_like(acc_sc)

    def _compute():
        # Fold 1/sqrt(E) into Q: O(H*tq*E) multiplies instead of O(H*tq*tk).
        q = q_ref[0] * scale                                   # (H, tq, E)
        k = k_ref[0]                                           # (H, tk, E)
        v = v_ref[0]                                           # (H, tk, Ev)

        # Q @ K^T, batched over heads, contracting the last dims directly so
        # no transposed K tile is materialized.  f32 accumulation on the MXU.
        s = lax.dot_general(q, k, (((2,), (2,)), ((0,), (0,))),
                            preferred_element_type=jnp.float32)  # (H, tq, tk)

        if causal:
            row = lax.broadcasted_iota(jnp.int32, (tq, tk), 0) + qi * tq
            col = lax.broadcasted_iota(jnp.int32, (tq, tk), 1) + ki * tk
            # torch.triu(ones, diagonal=1) -> strictly-upper triangle masked.
            s = jnp.where((col > row)[None, :, :], _MASK_VALUE, s)

        # Online softmax update (all statistics in f32).
        m_prev = m_sc[...]                                     # (H, tq, 1)
        m_new = jnp.maximum(m_prev, jnp.max(s, axis=-1, keepdims=True))
        alpha = jnp.exp(m_prev - m_new)                        # (H, tq, 1)
        p = jnp.exp(s - m_new)                                 # (H, tq, tk)

        l_sc[...] = alpha * l_sc[...] + jnp.sum(p, axis=-1, keepdims=True)
        pv = lax.dot_general(p.astype(v.dtype), v,
                             (((2,), (1,)), ((0,), (0,))),
                             preferred_element_type=jnp.float32)  # (H, tq, Ev)
        acc_sc[...] = alpha * acc_sc[...] + pv
        m_sc[...] = m_new

    if causal:
        # Skip kv tiles that lie entirely above the diagonal: they are fully
        # masked and contribute nothing (≈ halves MXU/VPU work).  Tile ki=0 is
        # never skipped, so every row always accumulates at least one column
        # and l_sc is strictly positive at finalize.
        @pl.when(ki * tk <= qi * tq + (tq - 1))
        def _():
            _compute()
    else:
        _compute()

    @pl.when(ki == nk - 1)
    def _finalize():
        # Deferred normalization: divide the (tq, Ev) accumulator once instead
        # of the (tq, tk) probabilities each kv step.  Exact reciprocal keeps
        # the 1e-5 tolerance.
        inv_l = pl.reciprocal(l_sc[...], approx=False)         # (H, tq, 1)
        o_ref[0] = (acc_sc[...] * inv_l).astype(o_ref.dtype)


def attention_forward(queries, keys, values, mask=True, output_attention=False):
    """Matches Attention.forward. Inputs in PyTorch (B, L, H, E) layout."""
    B, L, H, E = queries.shape
    _, Lv, _, Ev = values.shape
    scale = 1.0 / math.sqrt(E)
    causal = bool(mask)

    # Head-major layout for the kernel (thin XLA glue around the pallas_call).
    q = jnp.transpose(queries, (0, 2, 1, 3))   # (B, H, L, E)
    k = jnp.transpose(keys,    (0, 2, 1, 3))   # (B, H, Lv, E)
    v = jnp.transpose(values,  (0, 2, 1, 3))   # (B, H, Lv, Ev)

    tq = _pick_tile(L)
    tk = _pick_tile(Lv)
    nq = L // tq
    nk = Lv // tk

    kernel = functools.partial(_flash_attn_kernel, scale=scale, causal=causal,
                               tq=tq, tk=tk)

    itemsize = jnp.dtype(queries.dtype).itemsize
    flops = 2 * B * H * L * Lv * (E + Ev)
    if causal:
        flops //= 2                        # tiles above the diagonal skipped
    cost = pl.CostEstimate(
        flops=int(flops),
        transcendentals=int(B * H * L * Lv),
        bytes_accessed=int(itemsize * (q.size + k.size + v.size + B * H * L * Ev)),
    )

    out = pl.pallas_call(
        kernel,
        out_shape=jax.ShapeDtypeStruct((B, H, L, Ev), queries.dtype),
        grid_spec=pltpu.PrefetchScalarGridSpec(
            num_scalar_prefetch=0,
            grid=(B, nq, nk),              # kv (reduction) axis last
            in_specs=[
                pl.BlockSpec((1, H, tq, E),  lambda b, qi, ki: (b, 0, qi, 0)),
                pl.BlockSpec((1, H, tk, E),  lambda b, qi, ki: (b, 0, ki, 0)),
                pl.BlockSpec((1, H, tk, Ev), lambda b, qi, ki: (b, 0, ki, 0)),
            ],
            out_specs=pl.BlockSpec((1, H, tq, Ev), lambda b, qi, ki: (b, 0, qi, 0)),
            scratch_shapes=[
                pltpu.VMEM((H, tq, 1), jnp.float32),    # running max
                pltpu.VMEM((H, tq, 1), jnp.float32),    # running denominator
                pltpu.VMEM((H, tq, Ev), jnp.float32),   # running output acc
            ],
        ),
        compiler_params=pltpu.CompilerParams(
            dimension_semantics=("parallel", "parallel", "arbitrary"),
            # Above the 16/32 MiB scoped defaults, with headroom under v7x's
            # 64 MiB physical VMEM.
            vmem_limit_bytes=48 * 1024 * 1024,
        ),
        cost_estimate=cost,
    )(q, k, v)

    attention = jnp.transpose(out, (0, 2, 1, 3))   # (B, L, H, Ev)

    # output_attention=False path of the reference module; the flash-style
    # kernel never materializes the full attention matrix.
    return attention, None


def _reference(queries, keys, values, mask=True):
    """Pure-JAX mirror of the PyTorch forward, for verification."""
    B, L, H, E = queries.shape
    _, Lv, _, Ev = values.shape
    q = jnp.transpose(queries, (0, 2, 1, 3))            # (B, H, L, E)
    k = jnp.transpose(keys, (0, 2, 1, 3))               # (B, H, Lv, E)
    v = jnp.transpose(values, (0, 2, 1, 3))             # (B, H, Lv, Ev)
    scores = jnp.einsum('bhle,bhve->bhlv', q, k)
    if mask:
        tri = jnp.triu(jnp.ones((L, Lv), dtype=bool), k=1)[None, None]
        scores = jnp.where(tri, -jnp.inf, scores)
    attn = jax.nn.softmax(scores * (1.0 / math.sqrt(E)), axis=-1)
    out = jnp.einsum('bhlv,bhve->bhle', attn, v)
    return jnp.transpose(out, (0, 2, 1, 3))


if __name__ == "__main__":
    def _check(B, L, H, E, mask):
        Lv, Ev = L, E
        key = jax.random.PRNGKey(0)
        kq, kk, kv = jax.random.split(key, 3)
        queries = jax.random.normal(kq, (B, L, H, E), dtype=jnp.float32)
        keys_in = jax.random.normal(kk, (B, Lv, H, E), dtype=jnp.float32)
        values = jax.random.normal(kv, (B, Lv, H, Ev), dtype=jnp.float32)

        out, _ = attention_forward(queries, keys_in, values, mask=mask)
        out = jax.block_until_ready(out)

        ref = _reference(queries, keys_in, values, mask=mask)
        np.testing.assert_allclose(np.asarray(out), np.asarray(ref),
                                   rtol=2e-5, atol=2e-5)
        assert out.shape == (B, L, H, Ev)

    # Small shapes implied by the module (single kv tile), causal + full.
    _check(B=2, L=8, H=4, E=32, mask=True)
    _check(B=2, L=8, H=4, E=32, mask=False)
    # Multi-tile path: exercises online softmax across kv tiles + causal skip.
    _check(B=2, L=256, H=4, E=32, mask=True)

    print("KERNEL_OK")
</pallas_src>

<mosaic_0001>
module attributes {stable_mosaic.version = 11 : i64} {
  func.func @_flash_attn_kernel(%arg0: i32, %arg1: i32, %arg2: i32, %arg3: memref<1x4x8x32xf32, #tpu.memory_space<vmem>>, %arg4: memref<1x4x8x32xf32, #tpu.memory_space<vmem>>, %arg5: memref<1x4x8x32xf32, #tpu.memory_space<vmem>>, %arg6: memref<1x4x8x32xf32, #tpu.memory_space<vmem>>, %arg7: memref<4x8x1xf32, #tpu.memory_space<vmem>>, %arg8: memref<4x8x1xf32, #tpu.memory_space<vmem>>, %arg9: memref<4x8x32xf32, #tpu.memory_space<vmem>>) attributes {dimension_semantics = [#tpu.dimension_semantics<parallel>, #tpu.dimension_semantics<parallel>, #tpu.dimension_semantics<arbitrary>], iteration_bounds = array<i64: 2, 1, 1>, scalar_prefetch = 0 : i64, scratch_operands = 3 : i64, tpu.core_type = #tpu.core_type<tc>, window_params = [{transform_indices = @transform_0, window_bounds = array<i64: 1, 4, 8, 32>}, {transform_indices = @transform_1, window_bounds = array<i64: 1, 4, 8, 32>}, {transform_indices = @transform_2, window_bounds = array<i64: 1, 4, 8, 32>}, {transform_indices = @transform_3, window_bounds = array<i64: 1, 4, 8, 32>}]} {
    %c0_i32 = arith.constant 0 : i32
    %0 = arith.cmpi eq, %arg2, %c0_i32 : i32
    %1 = arith.extui %0 : i1 to i32
    %c0_i32_0 = arith.constant 0 : i32
    %2 = arith.cmpi ne, %1, %c0_i32_0 : i32
    scf.if %2 {
      %cst = arith.constant -2.38197633E+38 : f32
      %12 = vector.broadcast %cst : f32 to vector<4x8x1xf32>
      %c0 = arith.constant 0 : index
      %c0_5 = arith.constant 0 : index
      %c0_6 = arith.constant 0 : index
      %13 = vector.load %arg7[%c0, %c0_5, %c0_6] : memref<4x8x1xf32, #tpu.memory_space<vmem>>, vector<4x8x1xf32>
      tpu.vector_store %arg7[%c0, %c0_5, %c0_6], %12 {strides = array<i32>} : memref<4x8x1xf32, #tpu.memory_space<vmem>>, vector<4x8x1xf32>,
      %cst_7 = arith.constant 0.000000e+00 : f32
      %14 = vector.broadcast %cst_7 : f32 to vector<4x8x1xf32>
      %c0_8 = arith.constant 0 : index
      %c0_9 = arith.constant 0 : index
      %c0_10 = arith.constant 0 : index
      %15 = vector.load %arg8[%c0_8, %c0_9, %c0_10] : memref<4x8x1xf32, #tpu.memory_space<vmem>>, vector<4x8x1xf32>
      tpu.vector_store %arg8[%c0_8, %c0_9, %c0_10], %14 {strides = array<i32>} : memref<4x8x1xf32, #tpu.memory_space<vmem>>, vector<4x8x1xf32>,
      %cst_11 = arith.constant 0.000000e+00 : f32
      %16 = vector.broadcast %cst_11 : f32 to vector<4x8x32xf32>
      %c0_12 = arith.constant 0 : index
      %c0_13 = arith.constant 0 : index
      %c0_14 = arith.constant 0 : index
      %17 = vector.load %arg9[%c0_12, %c0_13, %c0_14] : memref<4x8x32xf32, #tpu.memory_space<vmem>>, vector<4x8x32xf32>
      tpu.vector_store %arg9[%c0_12, %c0_13, %c0_14], %16 {strides = array<i32>} : memref<4x8x32xf32, #tpu.memory_space<vmem>>, vector<4x8x32xf32>,
    } else {
    }
    %c8_i32 = arith.constant 8 : i32
    %3 = arith.muli %arg2, %c8_i32 : i32
    %c8_i32_1 = arith.constant 8 : i32
    %4 = arith.muli %arg1, %c8_i32_1 : i32
    %c7_i32 = arith.constant 7 : i32
    %5 = arith.addi %4, %c7_i32 : i32
    %6 = arith.cmpi sle, %3, %5 : i32
    %7 = arith.extui %6 : i1 to i32
    %c0_i32_2 = arith.constant 0 : i32
    %8 = arith.cmpi ne, %7, %c0_i32_2 : i32
    scf.if %8 {
      %c0 = arith.constant 0 : index
      %c0_5 = arith.constant 0 : index
      %c0_6 = arith.constant 0 : index
      %c0_7 = arith.constant 0 : index
      %12 = vector.load %arg3[%c0, %c0_5, %c0_6, %c0_7] : memref<1x4x8x32xf32, #tpu.memory_space<vmem>>, vector<1x4x8x32xf32>
      %13 = vector.shape_cast %12 : vector<1x4x8x32xf32> to vector<4x8x32xf32>
      %cst = arith.constant 0.176776692 : f32
      %14 = vector.broadcast %cst : f32 to vector<4x8x32xf32>
      %15 = arith.mulf %13, %14 : vector<4x8x32xf32>
      %c0_8 = arith.constant 0 : index
      %c0_9 = arith.constant 0 : index
      %c0_10 = arith.constant 0 : index
      %c0_11 = arith.constant 0 : index
      %16 = vector.load %arg4[%c0_8, %c0_9, %c0_10, %c0_11] : memref<1x4x8x32xf32, #tpu.memory_space<vmem>>, vector<1x4x8x32xf32>
      %17 = vector.shape_cast %16 : vector<1x4x8x32xf32> to vector<4x8x32xf32>
      %c0_12 = arith.constant 0 : index
      %c0_13 = arith.constant 0 : index
      %c0_14 = arith.constant 0 : index
      %c0_15 = arith.constant 0 : index
      %18 = vector.load %arg5[%c0_12, %c0_13, %c0_14, %c0_15] : memref<1x4x8x32xf32, #tpu.memory_space<vmem>>, vector<1x4x8x32xf32>
      %19 = vector.shape_cast %18 : vector<1x4x8x32xf32> to vector<4x8x32xf32>
      %cst_16 = arith.constant dense<0.000000e+00> : vector<4x8x8xf32>
      %20 = tpu.matmul %15, %17, %cst_16 {dimension_numbers = #tpu.dot_dimension_numbers<[2], [2], [1], [1], [0, 0, 0, 1, 1, 1], [0], [0]>} : vector<4x8x32xf32>, vector<4x8x32xf32>, vector<4x8x8xf32> -> vector<4x8x8xf32>
      %21 = tpu.iota {dimensions = array<i32: 0>} : vector<8x8xi32>
      %c8_i32_17 = arith.constant 8 : i32
      %22 = arith.muli %arg1, %c8_i32_17 : i32
      %23 = vector.broadcast %22 : i32 to vector<8x8xi32>
      %24 = arith.addi %21, %23 : vector<8x8xi32>
      %25 = tpu.iota {dimensions = array<i32: 1>} : vector<8x8xi32>
      %c8_i32_18 = arith.constant 8 : i32
      %26 = arith.muli %arg2, %c8_i32_18 : i32
      %27 = vector.broadcast %26 : i32 to vector<8x8xi32>
      %28 = arith.addi %25, %27 : vector<8x8xi32>
      %29 = arith.cmpi sgt, %28, %24 : vector<8x8xi32>
      %30 = vector.shape_cast %29 : vector<8x8xi1> to vector<1x8x8xi1>
      %cst_19 = arith.constant -2.38197633E+38 : f32
      %31 = vector.shape_cast %30 : vector<1x8x8xi1> to vector<1x8x8xi1>
      %32 = vector.broadcast %31 : vector<1x8x8xi1> to vector<4x8x8xi1>
      %33 = vector.broadcast %cst_19 : f32 to vector<4x8x8xf32>
      %34 = arith.select %32, %33, %20 : vector<4x8x8xi1>, vector<4x8x8xf32>
      %c0_20 = arith.constant 0 : index
      %c0_21 = arith.constant 0 : index
      %c0_22 = arith.constant 0 : index
      %35 = vector.load %arg7[%c0_20, %c0_21, %c0_22] : memref<4x8x1xf32, #tpu.memory_space<vmem>>, vector<4x8x1xf32>
      %cst_23 = arith.constant dense<0xFF800000> : vector<4x8xf32>
      %36 = vector.multi_reduction <maximumf>, %34, %cst_23 [2] : vector<4x8x8xf32> to vector<4x8xf32>
      %37 = vector.shape_cast %36 : vector<4x8xf32> to vector<4x8x1xf32>
      %38 = arith.maximumf %35, %37 : vector<4x8x1xf32>
      %39 = arith.subf %35, %38 : vector<4x8x1xf32>
      %40 = math.exp %39 : vector<4x8x1xf32>
      %41 = vector.broadcast %38 : vector<4x8x1xf32> to vector<4x8x8xf32>
      %42 = arith.subf %34, %41 : vector<4x8x8xf32>
      %43 = math.exp %42 : vector<4x8x8xf32>
      %c0_24 = arith.constant 0 : index
      %c0_25 = arith.constant 0 : index
      %c0_26 = arith.constant 0 : index
      %44 = vector.load %arg8[%c0_24, %c0_25, %c0_26] : memref<4x8x1xf32, #tpu.memory_space<vmem>>, vector<4x8x1xf32>
      %45 = arith.mulf %40, %44 : vector<4x8x1xf32>
      %cst_27 = arith.constant dense<0.000000e+00> : vector<4x8xf32>
      %46 = vector.multi_reduction <add>, %43, %cst_27 [2] : vector<4x8x8xf32> to vector<4x8xf32>
      %47 = vector.shape_cast %46 : vector<4x8xf32> to vector<4x8x1xf32>
      %48 = arith.addf %45, %47 : vector<4x8x1xf32>
      %c0_28 = arith.constant 0 : index
      %c0_29 = arith.constant 0 : index
      %c0_30 = arith.constant 0 : index
      %49 = vector.load %arg8[%c0_28, %c0_29, %c0_30] : memref<4x8x1xf32, #tpu.memory_space<vmem>>, vector<4x8x1xf32>
      tpu.vector_store %arg8[%c0_28, %c0_29, %c0_30], %48 {strides = array<i32>} : memref<4x8x1xf32, #tpu.memory_space<vmem>>, vector<4x8x1xf32>,
      %cst_31 = arith.constant dense<0.000000e+00> : vector<4x8x32xf32>
      %50 = tpu.matmul %43, %19, %cst_31 {dimension_numbers = #tpu.dot_dimension_numbers<[2], [1], [1], [2], [0, 0, 0, 1, 1, 2], [0], [0]>} : vector<4x8x8xf32>, vector<4x8x32xf32>, vector<4x8x32xf32> -> vector<4x8x32xf32>
      %c0_32 = arith.constant 0 : index
      %c0_33 = arith.constant 0 : index
      %c0_34 = arith.constant 0 : index
      %51 = vector.load %arg9[%c0_32, %c0_33, %c0_34] : memref<4x8x32xf32, #tpu.memory_space<vmem>>, vector<4x8x32xf32>
      %52 = vector.broadcast %40 : vector<4x8x1xf32> to vector<4x8x32xf32>
      %53 = arith.mulf %52, %51 : vector<4x8x32xf32>
      %54 = arith.addf %53, %50 : vector<4x8x32xf32>
      %c0_35 = arith.constant 0 : index
      %c0_36 = arith.constant 0 : index
      %c0_37 = arith.constant 0 : index
      %55 = vector.load %arg9[%c0_35, %c0_36, %c0_37] : memref<4x8x32xf32, #tpu.memory_space<vmem>>, vector<4x8x32xf32>
      tpu.vector_store %arg9[%c0_35, %c0_36, %c0_37], %54 {strides = array<i32>} : memref<4x8x32xf32, #tpu.memory_space<vmem>>, vector<4x8x32xf32>,
      %c0_38 = arith.constant 0 : index
      %c0_39 = arith.constant 0 : index
      %c0_40 = arith.constant 0 : index
      %56 = vector.load %arg7[%c0_38, %c0_39, %c0_40] : memref<4x8x1xf32, #tpu.memory_space<vmem>>, vector<4x8x1xf32>
      tpu.vector_store %arg7[%c0_38, %c0_39, %c0_40], %38 {strides = array<i32>} : memref<4x8x1xf32, #tpu.memory_space<vmem>>, vector<4x8x1xf32>,
    } else {
    }
    %c0_i32_3 = arith.constant 0 : i32
    %9 = arith.cmpi eq, %arg2, %c0_i32_3 : i32
    %10 = arith.extui %9 : i1 to i32
    %c0_i32_4 = arith.constant 0 : i32
    %11 = arith.cmpi ne, %10, %c0_i32_4 : i32
    scf.if %11 {
      %c0 = arith.constant 0 : index
      %c0_5 = arith.constant 0 : index
      %c0_6 = arith.constant 0 : index
      %12 = vector.load %arg8[%c0, %c0_5, %c0_6] : memref<4x8x1xf32, #tpu.memory_space<vmem>>, vector<4x8x1xf32>
      %13 = tpu.reciprocal %12 : vector<4x8x1xf32> -> vector<4x8x1xf32>
      %c0_7 = arith.constant 0 : index
      %c0_8 = arith.constant 0 : index
      %c0_9 = arith.constant 0 : index
      %14 = vector.load %arg9[%c0_7, %c0_8, %c0_9] : memref<4x8x32xf32, #tpu.memory_space<vmem>>, vector<4x8x32xf32>
      %15 = vector.broadcast %13 : vector<4x8x1xf32> to vector<4x8x32xf32>
      %16 = arith.mulf %14, %15 : vector<4x8x32xf32>
      %c0_10 = arith.constant 0 : index
      %c0_11 = arith.constant 0 : index
      %c0_12 = arith.constant 0 : index
      %c0_13 = arith.constant 0 : index
      %17 = vector.load %arg6[%c0_10, %c0_11, %c0_12, %c0_13] : memref<1x4x8x32xf32, #tpu.memory_space<vmem>>, vector<1x4x8x32xf32>
      %18 = vector.shape_cast %17 : vector<1x4x8x32xf32> to vector<4x8x32xf32>
      %19 = vector.shape_cast %16 : vector<4x8x32xf32> to vector<1x4x8x32xf32>
      tpu.vector_store %arg6[%c0_10, %c0_11, %c0_12, %c0_13], %19 {strides = array<i32>} : memref<1x4x8x32xf32, #tpu.memory_space<vmem>>, vector<1x4x8x32xf32>,
    } else {
    }
    return
  }
  func.func @transform_0(%arg0: i32, %arg1: i32, %arg2: i32) -> (i32, i32, i32, i32) {
    %c0_i32 = arith.constant 0 : i32
    %c0_i32_0 = arith.constant 0 : i32
    %c0_i32_1 = arith.constant 0 : i32
    return %arg0, %c0_i32, %arg1, %c0_i32_0 : i32, i32, i32, i32
  }
  func.func @transform_1(%arg0: i32, %arg1: i32, %arg2: i32) -> (i32, i32, i32, i32) {
    %c0_i32 = arith.constant 0 : i32
    %c0_i32_0 = arith.constant 0 : i32
    %c0_i32_1 = arith.constant 0 : i32
    return %arg0, %c0_i32, %arg2, %c0_i32_0 : i32, i32, i32, i32
  }
  func.func @transform_2(%arg0: i32, %arg1: i32, %arg2: i32) -> (i32, i32, i32, i32) {
    %c0_i32 = arith.constant 0 : i32
    %c0_i32_0 = arith.constant 0 : i32
    %c0_i32_1 = arith.constant 0 : i32
    return %arg0, %c0_i32, %arg2, %c0_i32_0 : i32, i32, i32, i32
  }
  func.func @transform_3(%arg0: i32, %arg1: i32, %arg2: i32) -> (i32, i32, i32, i32) {
    %c0_i32 = arith.constant 0 : i32
    %c0_i32_0 = arith.constant 0 : i32
    %c0_i32_1 = arith.constant 0 : i32
    return %arg0, %c0_i32, %arg1, %c0_i32_0 : i32, i32, i32, i32
  }
}

</mosaic_0001>

<bundles_post_ra>
// kernel: tpu_custom_call.1
= control target key start
LH: loop header
LB: loop body
LE: loop exit
PB: predicated region body
PF: predicated region fallthrough
CT: control target
= control target key end

     0   :  { %s2082_s0 = inlined_call_operand.hbm [shape: f32[2,4,8,32], index: 0, kind: input, shape index: {}]   ;;  %s2083_s1 = inlined_call_operand.hbm [shape: f32[2,4,8,32], index: 1, kind: input, shape index: {}]   ;;  %s2084_s2 = inlined_call_operand.hbm [shape: f32[2,4,8,32], index: 2, kind: input, shape index: {}]   ;;  %s2085_s3 = inlined_call_operand.hbm [shape: f32[2,4,8,32], index: 3, kind: output, shape index: {}]  }
   0x1   :  { %2095 = sst [smem:[#allocation18_spill]] %s2083_s1 }
   0x2   :  { %8 = vsyncpa [#allocation6], 0 }
   0x3   :  { %10 = vsyncpa [#allocation6 + $0x1], 0 }
   0x4   :  { %11 = vsyncpa [#allocation9], 0 }
   0x5   :  { %13 = vsyncpa [#allocation9 + $0x1], 0 }
   0x6   :  { %14 = vsyncpa [#allocation7], 0 }
   0x7   :  { %16 = vsyncpa [#allocation7 + $0x1], 0  ;;  %s1688_s12 = smov 0   ;;  %s1690_s13 = smov 0  }
   0x8   :  { %s1692_s14 = smov 0   ;;  %s1694_s15 = smov 0  }
   0x9   :  { %s1696_s16 = smov 0   ;;  %s1698_s17 = smov 0  }
   0xa LB: > { %2096 = sst [smem:[#allocation15_spill]] %s1650_s16  ;;  %s1719_s18 = sadd.s32 4294967295, %s1654_s17   ;;  %s1654_s17 = sphi %s1698_s17, %s22_s17   ;;  %s1650_s16 = sphi %s1696_s16, %s2119_s16   ;;  %s1646_s15 = sphi %s1694_s15, %s2118_s15   ;;  %s1642_s14 = sphi %s1692_s14, %s2122_s14   ;;  %s1638_s13 = sphi %s1690_s13, %s2121_s13   ;;  %s1634_s12 = sphi %s1688_s12, %s2120_s12  }
   0xb   : > { %s1278_s19 = sadd.s32 4294967294, %s1654_s17   ;;  %s41_s20 = sadd.s32 1, %s1650_s16 }
   0xc   : > { %s50_s21 = sadd.s32 1, %s1642_s14  ;;  %p43_p0 = scmp.ge.s32.totalorder %s41_s20, 2 }
   0xd   : > { %p57_p1 = scmp.ne.s32.totalorder %s1642_s14, %s1638_s13  ;;  %p58_p2 = scmp.eq.s32.totalorder %s1654_s17, 0 }
   0xe   : > { %p63_p3 = scmp.ne.s32.totalorder %s1638_s13, %s1634_s12  ;;  %s2124_s20 = smov (%p43_p0, %s41_s20), 0 }
   0xf   : > { %2097 = sst [smem:[#allocation16_spill]] %s2124_s20  ;;  %p1731_p4 = por %p58_p2, %p57_p1 }
  0x10   : > { %p64_p5 = scmp.eq.s32.totalorder %s1719_s18, 0  ;;  %s45_s23 = ssub.s32 %s1650_s16, %s2124_s20 }
  0x11   : > { %p145_p6 = scmp.eq.s32.totalorder %s1719_s18, 1  ;;  %p48_p7 = scmp.eq.s32.totalorder %s45_s23, 0 }
  0x12   : > { %p1739_p8 = por %p64_p5, %p63_p3  ;;  %p151_p10 = scmp.eq.s32.totalorder %s1278_s19, 1 }
  0x13   : > { %p1743_p9 = por %p145_p6, %p57_p1  ;;  %p1394_p13 = scmp.lt.s32.totalorder %s1654_s17, 2 }
  0x14   : > { %s2099_s24 = scalar_select %p1739_p8, 1, 0 }
  0x15   : > { %s2100_s25 = scalar_select %p1743_p9, 1, 0 }
  0x16   : > { %s1748_s26 = scalar_select %p48_p7, %s1642_s14, %s50_s21  }
  0x17   : > { %p1750_p11 = por %p151_p10, %p63_p3  ;;  %s2088_s28 = sand.u32 1, %s1642_s14  }
  0x18   : > { %2101 = sst [smem:[#allocation17_spill]] %s1748_s26  ;;  %s1759_s29 = sshll.u32 %s2088_s28, 5 }
  0x19   : > { %s2102_s27 = scalar_select %p1750_p11, 1, 0 }
  0x1a   : > { %s1762_s30 = sshll.u32 %s1650_s16, 9  ;;  %p1766_p0 = pnand %p1394_p13, %p1731_p4 }
  0x1b   : > { %s193_s5 = sand.u32 1, %s1654_s17   ;;  %s2104_s1 = sld [smem:[#allocation18_spill]] }
  0x1c   : > { %s197_s9 = scalar_lea.vmem [#allocation8], %s1759_s29  ;;  %s1782_s11 = scalar_lea.sflag [#allocation9], %s193_s5 }
  0x1d   : > { %s205_s10 = sshll.u32 %s197_s9, 4  ;;  %p1788_p4 = pneg %p1766_p0  ;;  %s1779_s10 = int_to_ptr.vmem [resolvable:$true] %s205_s10 }
  0x21   : > { %s1775_s8 = scalar_lea.hbm %s2104_s1, %s1762_s30  ;;  %s1483_s6 = scalar_lea.hbm %s2104_s1, 1024 }
  0x22   : > { %s1478_s19 = scalar_lea.hbm %s1775_s8, 512  ;;  %p1484_p7 = scmp.lt.u32.totalorder %s1775_s8, %s2104_s1 }
  0x23   : > { %p1479_p3 = scmp.ne.s32.totalorder %s1775_s8, %s1478_s19  ;;  %p1485_p10 = scmp.lt.u32.totalorder %s1483_s6, %s1478_s19 }
  0x24   : > { %p1487_p12 = scmp.lt.u32.totalorder %s1478_s19, %s1775_s8 }
  0x25   : > { %p1481_p5 = pnand %p1788_p4, %p1479_p3  ;;  %p1486_p13 = por %p1485_p10, %p1484_p7 }
  0x27   : > { %p1482_p6 = pneg %p1481_p5  ;;  %p1488_p1 = por %p1487_p12, %p1486_p13 }
  0x29   : > { %p1489_p2 = pnand %p1488_p1, %p1482_p6 }
  0x2b   : > { %1492 = shalt.err (!%p1489_p2)
}
  0x2c   : > { %s1493_s5 = scalar_lea.vmem %s1779_s10, 512  ;;  %s1656_s22 = smov [#allocation8]  }
  0x2d   : > { %p1494_p3 = scmp.ne.s32.totalorder %s1779_s10, %s1493_s5  ;;  %s1498_s23 = sshll.u32 %s1656_s22, 4  ;;  %s1499_s23 = int_to_ptr.vmem [resolvable:$false] %s1498_s23 }
  0x2e   : > { %s1500_s7 = scalar_lea.vmem %s1499_s23, 1024  ;;  %p1501_p9 = scmp.lt.s32.totalorder %s1779_s10, %s1499_s23 }
  0x2f   : > { %p1496_p5 = pnand %p1494_p3, %p1788_p4  ;;  %p1502_p8 = scmp.lt.s32.totalorder %s1500_s7, %s1493_s5 }
  0x31   : > { %p1497_p11 = pneg %p1496_p5  ;;  %p1503_p7 = por %p1502_p8, %p1501_p9 }
  0x33   : > { %p1504_p10 = pnand %p1503_p7, %p1497_p11 }
  0x35   : > { %1507 = shalt.err (!%p1504_p10)
}
  0x36   : > { %s2089_s19 = smov 128   ;;  %s2091_s6 = smov 8  }
  0x37   : > { %1386 = dma.hbm_to_vmem [thread:$0]  (!%p1766_p0), %s1775_s8, 512, %s1779_s10, %s1782_s11, %s2089_s19, %s2089_s19, %s2091_s6  }
  0x38   : > { %p2106_p8 = scmp.lt.s32.totalorder %s1654_s17, 3  ;;  %p2107_p9 = scmp.ge.s32.totalorder %s1654_s17, 1 }
  0x39   : > { %s1827_s23 = scalar_lea.hbm %s2082_s0, %s1762_s30  ;;  %s175_s7 = scalar_lea.vmem [#allocation5], %s1759_s29 }
  0x3a   : > { %p1819_p11 = pnand %p2107_p9, %p2106_p8  ;;  %s183_s28 = sshll.u32 %s175_s7, 4  ;;  %s1830_s28 = int_to_ptr.vmem [resolvable:$true] %s183_s28 }
  0x3b   : > { %s1836_s19 = scalar_lea.hbm %s2084_s2, %s1762_s30  ;;  %s2109_s6 = sand.u32 1, %s1642_s14  }
  0x3c   : > { %s2108_s9 = scalar_select %p1819_p11, 1, 0 }
  0x3d   : > { %s1840_s1 = scalar_lea.sflag [#allocation6], %s2109_s6  ;;  %s1508_s20 = scalar_lea.hbm %s1827_s23, 512 }
  0x3e   : > { %p1509_p12 = scmp.ne.s32.totalorder %s1827_s23, %s1508_s20  ;;  %s1513_s16 = scalar_lea.hbm %s2082_s0, 1024 }
  0x3f   : > { %p1514_p6 = scmp.lt.u32.totalorder %s1827_s23, %s2082_s0  ;;  %p1515_p13 = scmp.lt.u32.totalorder %s1513_s16, %s1508_s20 }
  0x40   : > { %p1511_p1 = pnand %p1509_p12, %p1788_p4  ;;  %p1517_p5 = scmp.lt.u32.totalorder %s1508_s20, %s1827_s23 }
  0x41   : > { %p1516_p3 = por %p1515_p13, %p1514_p6 }
  0x42   : > { %p1512_p2 = pneg %p1511_p1 }
  0x43   : > { %p1518_p7 = por %p1517_p5, %p1516_p3 }
  0x45   : > { %p1519_p10 = pnand %p1518_p7, %p1512_p2 }
  0x47   : > { %1522 = shalt.err (!%p1519_p10)
}
  0x48   : > { %s1523_s30 = scalar_lea.vmem %s1830_s28, 512  ;;  %s1659_s6 = smov [#allocation5]  }
  0x49   : > { %p1524_p8 = scmp.ne.s32.totalorder %s1830_s28, %s1523_s30  ;;  %s1528_s8 = sshll.u32 %s1659_s6, 4  ;;  %s1529_s8 = int_to_ptr.vmem [resolvable:$false] %s1528_s8 }
  0x4a   : > { %s1530_s26 = scalar_lea.vmem %s1529_s8, 1024  ;;  %p1531_p1 = scmp.lt.s32.totalorder %s1830_s28, %s1529_s8 }
  0x4b   : > { %p1526_p9 = pnand %p1524_p8, %p1788_p4  ;;  %p1532_p11 = scmp.lt.s32.totalorder %s1530_s26, %s1523_s30 }
  0x4d   : > { %p1527_p12 = pneg %p1526_p9  ;;  %p1533_p6 = por %p1532_p11, %p1531_p1 }
  0x4f   : > { %p1534_p13 = pnand %p1533_p6, %p1527_p12 }
  0x51   : > { %1537 = shalt.err (!%p1534_p13)
}
  0x52   : > { %s2110_s16 = smov 8   ;;  %s2111_s20 = smov 128  }
  0x53   : > { %1383 = dma.hbm_to_vmem [thread:$0]  (!%p1766_p0), %s1827_s23, 512, %s1830_s28, %s1840_s1, %s2111_s20, %s2111_s20, %s2110_s16  }
  0x54   : > { %s219_s10 = scalar_lea.vmem [#allocation10], %s1759_s29  ;;  %s1538_s22 = scalar_lea.hbm %s1836_s19, 512 }
  0x55   : > { %s227_s5 = sshll.u32 %s219_s10, 4  ;;  %p1539_p11 = scmp.ne.s32.totalorder %s1836_s19, %s1538_s22  ;;  %s1868_s5 = int_to_ptr.vmem [resolvable:$true] %s227_s5 }
  0x56   : > { %s1543_s6 = scalar_lea.hbm %s2084_s2, 1024  ;;  %p1544_p5 = scmp.lt.u32.totalorder %s1836_s19, %s2084_s2 }
  0x57   : > { %p1541_p2 = pnand %p1539_p11, %p1788_p4  ;;  %p1545_p7 = scmp.lt.u32.totalorder %s1543_s6, %s1538_s22 }
  0x58   : > { %p1547_p8 = scmp.lt.u32.totalorder %s1538_s22, %s1836_s19 }
  0x59   : > { %p1542_p3 = pneg %p1541_p2  ;;  %p1546_p10 = por %p1545_p7, %p1544_p5 }
  0x5b   : > { %p1548_p9 = por %p1547_p8, %p1546_p10 }
  0x5d   : > { %p1549_p12 = pnand %p1548_p9, %p1542_p3 }
  0x5f   : > { %1552 = shalt.err (!%p1549_p12)
}
  0x60   : > { %s1553_s1 = scalar_lea.vmem %s1868_s5, 512  ;;  %s1660_s28 = smov [#allocation10]  }
  0x61   : > { %p1554_p1 = scmp.ne.s32.totalorder %s1868_s5, %s1553_s1  ;;  %s1558_s29 = sshll.u32 %s1660_s28, 4  ;;  %s1559_s29 = int_to_ptr.vmem [resolvable:$false] %s1558_s29 }
  0x62   : > { %s1560_s23 = scalar_lea.vmem %s1559_s29, 1024  ;;  %p1561_p11 = scmp.lt.s32.totalorder %s1868_s5, %s1559_s29 }
  0x63   : > { %p1556_p6 = pnand %p1554_p1, %p1788_p4  ;;  %p1562_p2 = scmp.lt.s32.totalorder %s1560_s23, %s1553_s1 }
  0x65   : > { %p1557_p13 = pneg %p1556_p6  ;;  %p1563_p5 = por %p1562_p2, %p1561_p11 }
  0x67   : > { %p1564_p7 = pnand %p1563_p5, %p1557_p13 }
  0x69   : > { %1567 = shalt.err (!%p1564_p7)
}
  0x6a   : > { %1389 = dma.hbm_to_vmem [thread:$0]  (!%p1766_p0), %s1836_s19, 512, %s1868_s5, %s1782_s11, %s2111_s20, %s2111_s20, %s2110_s16  }
  0x6b   : > { %p2112_p4 = scmp.ne.s32.totalorder %s2108_s9, 0 }
  0x6c   : > { %s1898_s21 = sand.u32 (!%p2112_p4), 1, %s1638_s13   ;;  %p2113_p3 = scmp.ne.s32.totalorder (!%p2112_p4), %s2099_s24, 0 }
  0x6d   : > { %239 = sbr.rel (%p2112_p4) target bundleno = 948 (0x3b4), region = 32  ;;  %s1901_s10 = sshll.u32 (!%p2112_p4), %s1898_s21, 5 }
  0x6e   : > { %s242_s4 = scalar_lea.sflag (!%p2112_p4), [#allocation6], %s1898_s21  ;;  %s1905_s22 = scalar_lea.vmem (!%p2112_p4), [#allocation5], %s1901_s10 }
  0x74   : > { %1621 = dma.done.wait (%p2113_p3), %s242_s4, 512  }
  0x75   : > { %1623 = vsyncadd (%p2113_p3), %s242_s4, 4294966784  ;;  %s250_s11 = sand.u32 1, %s1719_s18   ;;  %s254_s9 = scalar_lea.vmem [#allocation8], %s1901_s10 }
  0x76   : > { %s251_s19 = scalar_lea.sflag [#allocation9], %s250_s11 }
  0x77   : > { %1625 = dma.done.wait (%p2113_p3), %s251_s19, 1024  }
  0x78   : > { %1627 = vsyncadd (%p2113_p3), %s251_s19, 4294966272  ;;  %vm309_vm0 = vcmask 261120   ;;  %v1661_v0 = vmov 0.0   ;;  %vm1662_vm1 = vmmov 0   ;;  %v329_v1 = vld [vmem:[%s254_s9] sm:$0xff]  ;;  %v330_v3 = vld [vmem:[%s254_s9 + $0x8] sm:$0xff]  ;;  %v642_v14 = vlaneseq }
  0x79   : > { %1332 = vmatprep.subr.mxu0 %v1661_v0  ;;  %310 = vst.msk [vmem:[#allocation4] sm:$0xff] %vm309_vm0, %v1661_v0  ;;  %311 = vst.msk [vmem:[#allocation4 + $0x8] sm:$0xff] %vm309_vm0, %v1661_v0  ;;  %1334 = vmatprep.mubr.msk.f32.mxu0 %vm1662_vm1, %v1661_v0  ;;  %v321_v2 = vld [vmem:[%s1905_s22] sm:$0xff]  ;;  %v322_v5 = vld [vmem:[%s1905_s22 + $0x8] sm:$0xff]  ;;  %vm300_vm2 = vcmask 7168   ;;  %vm661_vm4 = vcmask 64512  }
  0x7a   : > { %312 = vst.msk [vmem:[#allocation4 + $0x10] sm:$0xff] %vm309_vm0, %v1661_v0  ;;  %313 = vst.msk [vmem:[#allocation4 + $0x18] sm:$0xff] %vm309_vm0, %v1661_v0  ;;  %1337 = vmatprep.subr.mxu1 %v1661_v0  ;;  %1339 = vmatprep.mubr.msk.f32.mxu1 %vm1662_vm1, %v1661_v0  ;;  %v325_v4 = vmul.f32 0.17677669, %v321_v2  ;;  %v323_v6 = vld [vmem:[%s1905_s22 + $0x10] sm:$0xff]  ;;  %v324_v9 = vld [vmem:[%s1905_s22 + $0x18] sm:$0xff] }
  0x7b   : > { %1333 = vmatpush3.xpose.msk.msra.mxu0 %vm309_vm0, %v329_v1  ;;  %1338 = vmatpush3.xpose.msk.msra.mxu1 %vm309_vm0, %v330_v3  ;;  %v326_v7 = vmul.f32 0.17677669, %v322_v5  ;;  %v331_v8 = vld [vmem:[%s254_s9 + $0x10] sm:$0xff]  ;;  %v332_v10 = vld [vmem:[%s254_s9 + $0x18] sm:$0xff]  ;;  %v327_v11 = vmul.f32 0.17677669, %v323_v6 }
  0x7c   : > { %1342 = vmatprep.subr.mxu0 %v1661_v0  ;;  %1347 = vmatprep.subr.mxu1 %v1661_v0  ;;  %v328_v12 = vmul.f32 0.17677669, %v324_v9  ;;  %v1663_v13 = vmov -2.3819763e+38   ;;  %305 = vst.msk [vmem:[#allocation3] sm:$0xff] %vm300_vm2, %v1661_v0  ;;  %306 = vst.msk [vmem:[#allocation3 + $0x8] sm:$0xff] %vm300_vm2, %v1661_v0 }
  0x7d   : > { %301 = vst.msk [vmem:[#allocation2] sm:$0xff] %vm300_vm2, %v1663_v13  ;;  %302 = vst.msk [vmem:[#allocation2 + $0x8] sm:$0xff] %vm300_vm2, %v1663_v13  ;;  %v643_v15 = vshrl.u32 %v642_v14, 7  ;;  %v647_v16 = vand.u32 127, %v642_v14  ;;  %v1664_v33 = vmov 0   ;;  %s263_s18 = scalar_lea.vmem [#allocation10], %s1901_s10 }
  0x7e   : > { %1335 = vmatmul.mubr.msk.f32.vlgmr.msra.gmra.mrb[0].mxu0 %vm309_vm0, %v325_v4  ;;  %1340 = vmatmul.mubr.msk.f32.vlgmr.msra.gmra.mrb[0].mxu1 %vm309_vm0, %v326_v7  ;;  %303 = vst.msk [vmem:[#allocation2 + $0x10] sm:$0xff] %vm300_vm2, %v1663_v13  ;;  %304 = vst.msk [vmem:[#allocation2 + $0x18] sm:$0xff] %vm300_vm2, %v1663_v13  ;;  %v333_v50 = vld [vmem:[%s263_s18] sm:$0xff]  ;;  %v334_v51 = vld [vmem:[%s263_s18 + $0x8] sm:$0xff]  ;;  %s295_s24 = scalar_lea.vmem [#allocation11], %s1901_s10  ;;  %s1315_s20 = sshll.u32 %s1646_s15, 9 }
  0x7f   : > { %1343 = vmatpush3.xpose.msk.msra.mxu0 %vm309_vm0, %v331_v8  ;;  %1344 = vmatprep.mubr.msk.f32.mxu0 %vm1662_vm1, %v1661_v0  ;;  %307 = vst.msk [vmem:[#allocation3 + $0x10] sm:$0xff] %vm300_vm2, %v1661_v0  ;;  %308 = vst.msk [vmem:[#allocation3 + $0x18] sm:$0xff] %vm300_vm2, %v1661_v0  ;;  %vm650_vm3 = vcmp.gt.s32.totalorder %v647_v16, %v643_v15  ;;  %v335_v63 = vld [vmem:[%s263_s18 + $0x10] sm:$0xff]  ;;  %v336_v4 = vld [vmem:[%s263_s18 + $0x18] sm:$0xff]  ;;  %s1142_s16 = sshll.u32 %s295_s24, 4  ;;  %s2032_s30 = scalar_lea.hbm %s2085_s3, %s1315_s20  ;;  %s2026_s16 = int_to_ptr.vmem [resolvable:$true] %s1142_s16 }
  0x80   : > { %1348 = vmatpush3.xpose.msk.msra.mxu1 %vm309_vm0, %v332_v10  ;;  %1349 = vmatprep.mubr.msk.f32.mxu1 %vm1662_vm1, %v1661_v0  ;;  %s1128_s6 = scalar_lea.sflag [#allocation7], %s1898_s21  ;;  %s1568_s8 = scalar_lea.vmem %s2026_s16, 512 }
  0x81   : > { %1352 = vmatprep.subr.mxu0 %v1661_v0  ;;  %1357 = vmatprep.subr.mxu1 %v1661_v0  ;;  %p1569_p0 = scmp.ne.s32.totalorder %s2026_s16, %s1568_s8  ;;  %p2114_p10 = scmp.ne.s32.totalorder %s2100_s25, 0 }
  0x82   : > { %1345 = vmatmul.mubr.msk.f32.vlgmr.msra.gmra.mrb[2].mxu0 %vm309_vm0, %v327_v11  ;;  %1452 = vset.pattern.permute.xlu0 %v1664_v33  ;;  %s1665_s15 = smov [#allocation11]  }
  0x83   : > { %1350 = vmatmul.mubr.msk.f32.vlgmr.msra.gmra.mrb[2].mxu1 %vm309_vm0, %v328_v12  ;;  %1354 = vmatprep.mubr.msk.f32.mxu0 %vm1662_vm1, %v1661_v0  ;;  %p1570_p8 = pnand %p1569_p0, %p2114_p10  ;;  %s1572_s26 = sshll.u32 %s1665_s15, 4  ;;  %s1573_s26 = int_to_ptr.vmem [resolvable:$false] %s1572_s26 }
  0x84   : > { %1359 = vmatprep.mubr.msk.f32.mxu1 %vm1662_vm1, %v1661_v0  ;;  %1453 = vset.pattern.permute.xlu1 %v1664_v33  ;;  %v1971_v34 = vld [vmem:[#allocation2] sm:$0xff]  ;;  %v1976_v37 = vld [vmem:[#allocation2 + $0x8] sm:$0xff]  ;;  %s1574_s1 = scalar_lea.vmem %s1573_s26, 1024  ;;  %p1575_p12 = scmp.lt.s32.totalorder %s2026_s16, %s1573_s26 }
  0x85   : > { %v1978_v38 = vld [vmem:[#allocation2 + $0x10] sm:$0xff]  ;;  %v1987_v44 = vld [vmem:[#allocation2 + $0x18] sm:$0xff]  ;;  %1353 = vmatpush3.msra.mxu0 %v333_v50  ;;  %1358 = vmatpush3.msra.mxu1 %v334_v51  ;;  %p1571_p9 = pneg %p1570_p8  ;;  %p1576_p1 = scmp.lt.s32.totalorder %s1574_s1, %s1568_s8 }
  0x86   : > { %1362 = vmatprep.subr.mxu0 %v1661_v0  ;;  %1367 = vmatprep.subr.mxu1 %v1661_v0 }
  0x87   : > { %p1577_p6 = por %p1576_p1, %p1575_p12 }
  0x89   : > { %p1578_p13 = pnand %p1577_p6, %p1571_p9 }
 0x151   : > { %v410_v17 = vpop.f32.mrb[0].mxu0  ;;  %v486_v18 = vpop.f32.mrb[0].mxu1 }
 0x152   : > { %v653_v19 = vsel %vm650_vm3, -2.3819763e+38, %v410_v17  ;;  %v1336_v20 = vpop.f32.mrb[1].mxu0  ;;  %v654_v21 = vsel %vm650_vm3, -2.3819763e+38, %v486_v18  ;;  %v1341_v22 = vpop.f32.mrb[1].mxu1 }
 0x153   : > { %v662_v23 = vsel %vm661_vm4, %v653_v19, -inf  ;;  %v665_v24 = vsel %vm661_vm4, %v654_v21, -inf  ;;  %v722_v18 = vld [vmem:[#allocation3] sm:$0xff] }
 0x154   : > { %663 = vmax.xlane.f32.xlu0 %v662_v23 }
 0x155   : > { %v562_v25 = vpop.f32.mrb[2].mxu0 }
 0x156   : > { %v655_v26 = vsel %vm650_vm3, -2.3819763e+38, %v562_v25  ;;  %v1346_v27 = vpop.f32.mrb[3].mxu0  ;;  %v638_v28 = vpop.f32.mrb[2].mxu1  ;;  %v724_v25 = vld [vmem:[#allocation3 + $0x10] sm:$0xff] }
 0x157   : > { %v656_v29 = vsel %vm650_vm3, -2.3819763e+38, %v638_v28  ;;  %v668_v30 = vsel %vm661_vm4, %v655_v26, -inf  ;;  %v1351_v31 = vpop.f32.mrb[3].mxu1 }
 0x158   : > { %666 = vmax.xlane.f32.xlu0 %v665_v24  ;;  %669 = vmax.xlane.f32.xlu1 %v668_v30  ;;  %v671_v32 = vsel %vm661_vm4, %v656_v29, -inf }
 0x15c   : > { %672 = vmax.xlane.f32.xlu1 %v671_v32 }
 0x1e1   : > { %v664_v35 = vpop.xlane.xlu0 %663 }
 0x1e2   : > { %v1974_v36 = vmax.f32 %v1971_v34, %v664_v35 }
 0x1e4   : > { %v678_v39 = vsub.f32 %v1971_v34, %v1974_v36  ;;  %1079 = vst.msk [vmem:[#allocation2] sm:$0xff] %vm300_vm2, %v1974_v36  ;;  %692 = vperm.xlu0 %1452, %v1974_v36  }
 0x1e5   : > { %v667_v40 = vpop.xlane.xlu0 %666  ;;  %v670_v41 = vpop.xlane.xlu1 %669 }
 0x1e6   : > { %v675_v42 = vmax.f32 %v1976_v37, %v667_v40  ;;  %v676_v43 = vmax.f32 %v1978_v38, %v670_v41  ;;  %v682_v12 = vmul.f32 1.442695, %v678_v39 }
 0x1e8   : > { %v679_v45 = vsub.f32 %v1976_v37, %v675_v42  ;;  %1080 = vst.msk [vmem:[#allocation2 + $0x8] sm:$0xff] %vm300_vm2, %v675_v42  ;;  %697 = vperm.xlu1 %1453, %v675_v42   ;;  %v680_v46 = vsub.f32 %v1978_v38, %v676_v43  ;;  %1081 = vst.msk [vmem:[#allocation2 + $0x10] sm:$0xff] %vm300_vm2, %v676_v43  ;;  %v1043_v42 = vld [vmem:[#allocation4] sm:$0xff] }
 0x1e9   : > { %v673_v47 = vpop.xlane.xlu1 %672 }
 0x1ea   : > { %v677_v48 = vmax.f32 %v1987_v44, %v673_v47  ;;  %v684_v10 = vmul.f32 1.442695, %v679_v45  ;;  %v1044_v45 = vld [vmem:[#allocation4 + $0x8] sm:$0xff] }
 0x1ec   : > { %702 = vperm.xlu1 %1453, %v676_v43   ;;  %v681_v49 = vsub.f32 %v1987_v44, %v677_v48  ;;  %1082 = vst.msk [vmem:[#allocation2 + $0x18] sm:$0xff] %vm300_vm2, %v677_v48 }
 0x1ee   : > { %v688_v13 = vmul.f32 1.442695, %v681_v49 }
 0x1f0   : > { %707 = vperm.xlu1 %1453, %v677_v48  }
 0x263   : > { %v693_v52 = vpop.permute.xlu0 %692 }
 0x264   : > { %v710_v53 = vsub.f32 %v653_v19, %v693_v52  ;;  %v1045_v52 = vld [vmem:[#allocation4 + $0x10] sm:$0xff] }
 0x266   : > { %v714_v54 = vmul.f32 1.442695, %v710_v53 }
 0x267   : > { %v698_v55 = vpop.permute.xlu1 %697 }
 0x268   : > { %1454 = vpow2.f32 %v714_v54  ;;  %v711_v56 = vsub.f32 %v654_v21, %v698_v55  ;;  %v723_v21 = vld [vmem:[#allocation3 + $0x8] sm:$0xff] }
 0x26a   : > { %v716_v57 = vmul.f32 1.442695, %v711_v56 }
 0x26b   : > { %v703_v58 = vpop.permute.xlu1 %702 }
 0x26c   : > { %1456 = vpow2.f32 %v716_v57  ;;  %v712_v59 = vsub.f32 %v655_v26, %v703_v58  ;;  %v1046_v57 = vld [vmem:[#allocation4 + $0x18] sm:$0xff] }
 0x26e   : > { %v718_v60 = vmul.f32 1.442695, %v712_v59 }
 0x26f   : > { %v708_v61 = vpop.permute.xlu1 %707 }
 0x270   : > { %1458 = vpow2.f32 %v718_v60  ;;  %v713_v62 = vsub.f32 %v656_v29, %v708_v61  ;;  %v725_v29 = vld [vmem:[#allocation3 + $0x18] sm:$0xff] }
 0x272   : > { %v1455_v1 = vpop.eup %1454  ;;  %v720_v2 = vmul.f32 1.442695, %v713_v62 }
 0x273   : > { %1355 = vmatmul.mubr.msk.f32.vlgmr.msra.gmra.mrb[4].mxu0 %vm661_vm4, %v1455_v1  ;;  %v730_v3 = vsel %vm661_vm4, %v1455_v1, 0.0 }
 0x274   : > { %1460 = vpow2.f32 %v720_v2  ;;  %731 = vadd.xlane.f32.xlu1 %v730_v3  ;;  %1363 = vmatpush3.msra.mxu0 %v335_v63 }
 0x275   : > { %1364 = vmatprep.mubr.msk.f32.mxu0 %vm1662_vm1, %v1661_v0  ;;  %1462 = vpow2.f32 %v684_v10 }
 0x276   : > { %v1457_v5 = vpop.eup %1456  ;;  %1464 = vpow2.f32 %v682_v12 }
 0x277   : > { %1360 = vmatmul.mubr.msk.f32.vlgmr.msra.gmra.mrb[4].mxu1 %vm661_vm4, %v1457_v5  ;;  %v733_v6 = vsel %vm661_vm4, %v1457_v5, 0.0 }
 0x278   : > { %734 = vadd.xlane.f32.xlu0 %v733_v6  ;;  %1368 = vmatpush3.msra.mxu1 %v336_v4 }
 0x279   : > { %1369 = vmatprep.mubr.msk.f32.mxu1 %vm1662_vm1, %v1661_v0  ;;  %v686_v0 = vmul.f32 1.442695, %v680_v46 }
 0x27a   : > { %v1459_v7 = vpop.eup %1458 }
 0x27b   : > { %1365 = vmatmul.mubr.msk.f32.vlgmr.msra.gmra.mrb[6].mxu0 %vm661_vm4, %v1459_v7  ;;  %v736_v8 = vsel %vm661_vm4, %v1459_v7, 0.0  ;;  %1466 = vpow2.f32 %v686_v0 }
 0x27c   : > { %737 = vadd.xlane.f32.xlu1 %v736_v8  ;;  %1468 = vpow2.f32 %v688_v13 }
 0x27e   : > { %v1461_v9 = vpop.eup %1460 }
 0x27f   : > { %1370 = vmatmul.mubr.msk.f32.vlgmr.msra.gmra.mrb[6].mxu1 %vm661_vm4, %v1461_v9  ;;  %v739_v11 = vsel %vm661_vm4, %v1461_v9, 0.0  ;;  %v1463_v14 = vpop.eup %1462 }
 0x280   : > { %740 = vadd.xlane.f32.xlu1 %v739_v11  ;;  %v1465_v15 = vpop.eup %1464  ;;  %v727_v23 = vmul.f32 %v1463_v14, %v723_v21 }
 0x281   : > { %v726_v19 = vmul.f32 %v1465_v15, %v722_v18 }
 0x285   : > { %v1467_v16 = vpop.eup %1466 }
 0x286   : > { %v1469_v17 = vpop.eup %1468  ;;  %v728_v27 = vmul.f32 %v1467_v16, %v724_v25 }
 0x287   : > { %v729_v32 = vmul.f32 %v1469_v17, %v725_v29 }
 0x28e   : > { %1054 = vperm.xlu0 %1452, %v1463_v14  }
 0x291   : > { %1049 = vperm.xlu1 %1453, %v1465_v15  }
 0x295   : > { %1059 = vperm.xlu1 %1453, %v1467_v16  }
 0x299   : > { %1064 = vperm.xlu1 %1453, %v1469_v17  }
 0x301   : > { %v732_v20 = vpop.xlane.xlu1 %731 }
 0x302   : > { %v742_v22 = vadd.f32 %v732_v20, %v726_v19 }
 0x304   : > { %747 = vst.msk [vmem:[#allocation3] sm:$0xff] %vm300_vm2, %v742_v22 }
 0x305   : > { %v735_v24 = vpop.xlane.xlu0 %734 }
 0x306   : > { %v743_v26 = vadd.f32 %v735_v24, %v727_v23 }
 0x308   : > { %748 = vst.msk [vmem:[#allocation3 + $0x8] sm:$0xff] %vm300_vm2, %v743_v26 }
 0x309   : > { %v738_v28 = vpop.xlane.xlu1 %737 }
 0x30a   : > { %v744_v30 = vadd.f32 %v738_v28, %v728_v27 }
 0x30b   : > { %v1086_v31 = vld [vmem:[#allocation3] sm:$0xff] }
 0x30c   : > { %749 = vst.msk [vmem:[#allocation3 + $0x10] sm:$0xff] %vm300_vm2, %v744_v30  ;;  %1470 = vrcp.f32 %v1086_v31 }
 0x30d   : > { %v741_v33 = vpop.xlane.xlu1 %740  ;;  %v1055_v46 = vpop.permute.xlu0 %1054 }
 0x30e   : > { %v745_v34 = vadd.f32 %v741_v33, %v729_v32  ;;  %v1068_v51 = vmul.f32 %v1055_v46, %v1044_v45 }
 0x30f   : > { %v1087_v35 = vld [vmem:[#allocation3 + $0x8] sm:$0xff] }
 0x310   : > { %750 = vst.msk [vmem:[#allocation3 + $0x18] sm:$0xff] %vm300_vm2, %v745_v34  ;;  %1472 = vrcp.f32 %v1087_v35 }
 0x311   : > { %v1050_v43 = vpop.permute.xlu1 %1049 }
 0x312   : > { %v1067_v44 = vmul.f32 %v1050_v43, %v1043_v42 }
 0x313   : > { %v1088_v36 = vld [vmem:[#allocation3 + $0x10] sm:$0xff] }
 0x314   : > { %1474 = vrcp.f32 %v1088_v36 }
 0x315   : > { %v1060_v50 = vpop.permute.xlu1 %1059 }
 0x316   : > { %v1471_v37 = vpop.eup %1470  ;;  %v1069_v56 = vmul.f32 %v1060_v50, %v1045_v52 }
 0x317   : > { %1100 = vperm.xlu1 %1453, %v1471_v37   ;;  %v1089_v38 = vld [vmem:[#allocation3 + $0x18] sm:$0xff] }
 0x318   : > { %1476 = vrcp.f32 %v1089_v38 }
 0x319   : > { %v1065_v58 = vpop.permute.xlu1 %1064 }
 0x31a   : > { %v1473_v39 = vpop.eup %1472  ;;  %v1070_v62 = vmul.f32 %v1065_v58, %v1046_v57 }
 0x31b   : > { %1105 = vperm.xlu0 %1452, %v1473_v39  }
 0x31e   : > { %v1475_v40 = vpop.eup %1474 }
 0x31f   : > { %1110 = vperm.xlu1 %1453, %v1475_v40  }
 0x322   : > { %v1477_v41 = vpop.eup %1476 }
 0x323   : > { %1115 = vperm.xlu0 %1452, %v1477_v41  }
 0x346   : > { %v820_v47 = vpop.f32.mrb[4].mxu0 }
 0x347   : > { %v1071_v48 = vadd.f32 %v1067_v44, %v820_v47  ;;  %v1356_v49 = vpop.f32.mrb[5].mxu0 }
 0x349   : > { %1075 = vst.msk [vmem:[#allocation4] sm:$0xff] %vm309_vm0, %v1071_v48 }
 0x34a   : > { %v893_v53 = vpop.f32.mrb[4].mxu1 }
 0x34b   : > { %v1072_v54 = vadd.f32 %v1068_v51, %v893_v53  ;;  %v1361_v55 = vpop.f32.mrb[5].mxu1 }
 0x34d   : > { %1076 = vst.msk [vmem:[#allocation4 + $0x8] sm:$0xff] %vm309_vm0, %v1072_v54 }
 0x34e   : > { %v966_v59 = vpop.f32.mrb[6].mxu0 }
 0x34f   : > { %v1073_v60 = vadd.f32 %v1069_v56, %v966_v59  ;;  %v1366_v61 = vpop.f32.mrb[7].mxu0 }
 0x350   : > { %v1094_v3 = vld [vmem:[#allocation4] sm:$0xff] }
 0x351   : > { %1077 = vst.msk [vmem:[#allocation4 + $0x10] sm:$0xff] %vm309_vm0, %v1073_v60 }
 0x352   : > { %v1039_v63 = vpop.f32.mrb[6].mxu1 }
 0x353   : > { %v1074_v1 = vadd.f32 %v1070_v62, %v1039_v63  ;;  %v1371_v2 = vpop.f32.mrb[7].mxu1 }
 0x354   : > { %v1095_v6 = vld [vmem:[#allocation4 + $0x8] sm:$0xff] }
 0x355   : > { %1078 = vst.msk [vmem:[#allocation4 + $0x18] sm:$0xff] %vm309_vm0, %v1074_v1 }
 0x358   : > { %v1096_v9 = vld [vmem:[#allocation4 + $0x10] sm:$0xff] }
 0x35c   : > { %v1097_v0 = vld [vmem:[#allocation4 + $0x18] sm:$0xff] }
 0x396   : > { %v1101_v4 = vpop.permute.xlu1 %1100 }
 0x397   : > { %v1118_v5 = vmul.f32 %v1101_v4, %v1094_v3 }
 0x399   : > { %1123 = vst.msk [vmem:[%s295_s24] sm:$0xff] %vm309_vm0, %v1118_v5 }
 0x39a   : > { %v1106_v7 = vpop.permute.xlu0 %1105 }
 0x39b   : > { %v1119_v8 = vmul.f32 %v1106_v7, %v1095_v6 }
 0x39d   : > { %1124 = vst.msk [vmem:[%s295_s24 + $0x8] sm:$0xff] %vm309_vm0, %v1119_v8 }
 0x39e   : > { %v1111_v10 = vpop.permute.xlu1 %1110 }
 0x39f   : > { %v1120_v11 = vmul.f32 %v1111_v10, %v1096_v9 }
 0x3a1   : > { %1125 = vst.msk [vmem:[%s295_s24 + $0x10] sm:$0xff] %vm309_vm0, %v1120_v11 }
 0x3a2   : > { %v1116_v12 = vpop.permute.xlu0 %1115 }
 0x3a3   : > { %v1121_v13 = vmul.f32 %v1116_v12, %v1097_v0 }
 0x3a5   : > { %1126 = vst.msk [vmem:[%s295_s24 + $0x18] sm:$0xff] %vm309_vm0, %v1121_v13 }
 0x3a6   : > { %1581 = shalt.err (!%p1578_p13)
}
 0x3a7   : > { %s1582_s28 = scalar_lea.hbm %s2032_s30, 512  ;;  %s1586_s10 = scalar_lea.hbm %s2085_s3, 1024 }
 0x3a8   : > { %p1583_p11 = scmp.ne.s32.totalorder %s2032_s30, %s1582_s28  ;;  %p1587_p7 = scmp.lt.u32.totalorder %s2032_s30, %s2085_s3 }
 0x3a9   : > { %p1588_p4 = scmp.lt.u32.totalorder %s1586_s10, %s1582_s28  ;;  %p1590_p0 = scmp.lt.u32.totalorder %s1582_s28, %s2032_s30 }
 0x3aa   : > { %p1584_p2 = pnand %p1583_p11, %p2114_p10 }
 0x3ab   : > { %p1589_p3 = por %p1588_p4, %p1587_p7 }
 0x3ac   : > { %p1585_p5 = pneg %p1584_p2 }
 0x3ad   : > { %p1591_p8 = por %p1590_p0, %p1589_p3 }
 0x3af   : > { %p1592_p9 = pnand %p1591_p8, %p1585_p5 }
 0x3b1   : > { %1595 = shalt.err (!%p1592_p9)
}
 0x3b2   : > { %s1666_s11 = smov 128   ;;  %s1667_s19 = smov 8  }
 0x3b3   : > { %1378 = dma.vmem_to_hbm [thread:$0]  (%p2114_p10), %s2026_s16, 512, %s2032_s30, %s1128_s6, %s1666_s11, %s1666_s11, %s1667_s19  }
 0x3b4 PF: > { %s1157_s9 = sand.u32 1, %s1634_s12   ;;  %p2115_p12 = scmp.ne.s32.totalorder %s2102_s27, 0 }
 0x3b5   : > { %p2116_p1 = scmp.ge.s32.totalorder %s1654_s17, 2  ;;  %s1158_s18 = scalar_lea.sflag [#allocation7], %s1157_s9 }
 0x3b7   : > { %p1391_p6 = pnand %p2116_p1, %p2115_p12 }
 0x3b9   : > { %1629 = dma.done.wait (!%p1391_p6), %s1158_s18, 512  }
 0x3ba   : > { %1631 = vsyncadd (!%p1391_p6), %s1158_s18, 4294966784  ;;  %s22_s17 = sadd.s32 1, %s1654_s17   ;;  %s2117_s24 = sld [smem:[#allocation17_spill]] }
 0x3bb   : > { %p19_p13 = scmp.ge.s32.totalorder %s22_s17, 4   ;;  %s2118_s15 = sld [smem:[#allocation15_spill]] }
 0x3bc   : > { %s2119_s16 = sld [smem:[#allocation16_spill]]  ;;  %s2120_s12 = smov %s1638_s13 }
 0x3bd   : > { %s2121_s13 = smov %s1642_s14  ;;  %21 = sbr.rel (!%p19_p13) target bundleno = 10 (0xa), region = 113 }
 0x3c0   : > { %s2122_s14 = smov %s2117_s24 }
 0x3c4   :  { %1163 = vsyncpa [#allocation6], 1 }
 0x3c5   :  { %1165 = vsyncpa [#allocation6 + $0x1], 1 }
 0x3c6   :  { %1166 = vsyncpa [#allocation9], 1 }
 0x3c7   :  { %1168 = vsyncpa [#allocation9 + $0x1], 1 }
 0x3c8   :  { %1169 = vsyncpa [#allocation7], 1 }
 0x3c9   :  { %1171 = vsyncpa [#allocation7 + $0x1], 1 }

</bundles_post_ra>
